<compile_context>
chip_gen: v6e
topology: v6e:2x2x1
jax: 0.10.0
libtpu: 0.0.40
codegen_flags: <defaults>
</compile_context>

<pallas_src>
import functools
import json

import jax
import jax.numpy as jnp
from jax.experimental import pallas as pl
from jax.experimental.pallas import tpu as pltpu

_MiB = 1024 * 1024
_LANE = 128

_TMN_CANDIDATES = (1024, 768, 512, 384, 256, 128)   # output-tile dims (reuse)
_TK_CANDIDATES = (512, 256, 128)                    # reduction-tile dim


def _round_up(x, m):
    return ((x + m - 1) // m) * m


# ----------------------------------------------------------------------------
# Pallas kernels: output0[N, M] +=! input0[N, K] * input1[K, M]
# ----------------------------------------------------------------------------
def _kernel_direct(a_ref, b_ref, o_ref, *, compute_dtype):
    """Single K step per output tile: write the dot result directly."""
    a, b = a_ref[...], b_ref[...]
    if compute_dtype is not None:                     # per-tile in-kernel cast
        a, b = a.astype(compute_dtype), b.astype(compute_dtype)
    o_ref[...] = jnp.dot(a, b, preferred_element_type=jnp.float32).astype(o_ref.dtype)


def _kernel_acc_out(a_ref, b_ref, o_ref, *, compute_dtype):
    """f32 output: accumulate directly into the resident output tile
    (its index_map ignores the K axis, so it stays in VMEM across K)."""
    @pl.when(pl.program_id(2) == 0)
    def _():
        o_ref[...] = jnp.zeros_like(o_ref)

    a, b = a_ref[...], b_ref[...]
    if compute_dtype is not None:
        a, b = a.astype(compute_dtype), b.astype(compute_dtype)
    o_ref[...] += jnp.dot(a, b, preferred_element_type=jnp.float32)


def _kernel_acc_scratch(a_ref, b_ref, o_ref, acc_ref, *, compute_dtype):
    """Narrow output dtypes: f32 VMEM scratch accumulator, cast once at the end."""
    @pl.when(pl.program_id(2) == 0)
    def _():
        acc_ref[...] = jnp.zeros_like(acc_ref)

    a, b = a_ref[...], b_ref[...]
    if compute_dtype is not None:
        a, b = a.astype(compute_dtype), b.astype(compute_dtype)
    acc_ref[...] += jnp.dot(a, b, preferred_element_type=jnp.float32)

    @pl.when(pl.program_id(2) == pl.num_programs(2) - 1)
    def _():
        o_ref[...] = acc_ref[...].astype(o_ref.dtype)


# ----------------------------------------------------------------------------
# Tile selection helpers (generation aware)
# ----------------------------------------------------------------------------
def _vmem_limit_bytes():
    """Scoped VMEM limit with headroom: 96 MiB on 128 MiB parts (v5e/v6e),
    48 MiB on 64 MiB-per-TensorCore parts (v7x)."""
    phys = None
    try:
        phys = int(pltpu.get_tpu_info().vmem_capacity_bytes)
    except Exception:
        phys = None
    if phys is None:
        try:
            kind = jax.devices()[0].device_kind.lower()
        except Exception:
            kind = ""
        phys = 64 * _MiB if "v7" in kind else 128 * _MiB
    return 96 * _MiB if phys >= 128 * _MiB else 48 * _MiB


def _pick_tile(dim, candidates):
    """Largest 128-aligned candidate tile whose padding waste stays small."""
    dim128 = _round_up(max(int(dim), 1), _LANE)
    for c in candidates:
        if c > dim128:
            continue
        padded = _round_up(dim128, c)
        if padded - dim128 <= max(padded // 8, _LANE):
            return c
    return min(dim128, candidates[-1])


def _next_smaller(val, candidates):
    for c in candidates:  # descending
        if c < val:
            return c
    return candidates[-1]


def _working_set(tm, tn, tk, in_bytes, out_bytes, use_scratch, in_bufs=2):
    # BlockSpec multi-buffers every tiled operand (default 2-deep).
    b = in_bufs * (tm * tk + tk * tn) * in_bytes
    b += 2 * tm * tn * out_bytes
    if use_scratch:
        b += tm * tn * 4
    return b


# ----------------------------------------------------------------------------
# Pallas matmul: output0[N, M] +=! input0[N, K] * input1[K, M]
# ----------------------------------------------------------------------------
def pallas_matmul(a, b, *, compute_dtype=None, out_dtype=None,
                  tm=None, tn=None, tk=None):
    N, K = a.shape
    K2, M = b.shape
    assert K == K2, "contraction dims must match"

    out_dtype = jnp.dtype(out_dtype if out_dtype is not None else a.dtype)
    in_bytes = jnp.dtype(a.dtype).itemsize
    out_bytes = out_dtype.itemsize
    use_scratch = out_dtype != jnp.float32

    vmem_limit = _vmem_limit_bytes()
    budget = int(0.8 * vmem_limit)

    total_bytes = (N * K + K * M) * in_bytes + N * M * out_bytes

    if tm is None or tn is None or tk is None:
        if total_bytes <= 2 * _MiB:
            # Small problem: all operands fit in VMEM.  Still split the
            # parallel N axis 2-ways so both v7x TensorCores get work and
            # input/output DMA overlaps with compute on every generation.
            tk = _round_up(K, _LANE)
            tn = _round_up(M, _LANE)
            n128 = _round_up(N, _LANE)
            tm = n128 // 2 if n128 >= 256 else n128
        else:
            # Spend the VMEM budget on tm/tn (A/B reuse per output tile);
            # tk only sets K-loop granularity and doesn't cut HBM traffic.
            tm = _pick_tile(N, _TMN_CANDIDATES)
            tn = _pick_tile(M, _TMN_CANDIDATES)
            tk = _pick_tile(K, _TK_CANDIDATES)

            def fits(tm_, tn_, tk_):
                return _working_set(tm_, tn_, tk_, in_bytes, out_bytes,
                                    use_scratch) <= budget

            while not fits(tm, tn, tk) and tk > _TK_CANDIDATES[-1]:
                tk = _next_smaller(tk, _TK_CANDIDATES)
            while not fits(tm, tn, tk) and tn > _TMN_CANDIDATES[-1]:
                tn = _next_smaller(tn, _TMN_CANDIDATES)
            while not fits(tm, tn, tk) and tm > _TMN_CANDIDATES[-1]:
                tm = _next_smaller(tm, _TMN_CANDIDATES)

    # Zero-pad so every dim tiles evenly (zeros don't change the matmul);
    # slice the result back at the end.  Avoids full-extent fallback blocks
    # that can exceed the v7x 48 MiB scoped VMEM limit.
    N_p, K_p, M_p = _round_up(N, tm), _round_up(K, tk), _round_up(M, tn)
    if (N_p, K_p) != (N, K):
        a = jnp.pad(a, ((0, N_p - N), (0, K_p - K)))
    if (K_p, M_p) != (K, M):
        b = jnp.pad(b, ((0, K_p - K), (0, M_p - M)))

    grid = (N_p // tm, M_p // tn, K_p // tk)

    if grid[2] == 1:
        kernel, scratch = _kernel_direct, []
    elif not use_scratch:
        kernel, scratch = _kernel_acc_out, []
    else:
        kernel, scratch = _kernel_acc_scratch, [pltpu.VMEM((tm, tn), jnp.float32)]
    kernel = functools.partial(kernel, compute_dtype=compute_dtype)

    # Deeper input pipelining when per-step compute is short (small tiles,
    # many K steps).  Mainly helps v5e's low HBM-BW : MXU ratio.
    in_bufs = 2
    if (grid[2] >= 4 and max(tm, tn, tk) <= 256
            and _working_set(tm, tn, tk, in_bytes, out_bytes, use_scratch,
                             in_bufs=3) <= budget):
        in_bufs = 3
    pipe_kwargs = {} if in_bufs == 2 else {"pipeline_mode": pl.Buffered(in_bufs)}

    cost = pl.CostEstimate(
        flops=2 * N_p * M_p * K_p,
        transcendentals=0,
        # Real HBM traffic including A/B re-reads across output tiles.
        bytes_accessed=(N_p * K_p * in_bytes) * grid[1]
                       + (K_p * M_p * in_bytes) * grid[0]
                       + N_p * M_p * out_bytes,
    )

    out = pl.pallas_call(
        kernel,
        out_shape=jax.ShapeDtypeStruct((N_p, M_p), out_dtype),
        grid_spec=pltpu.PrefetchScalarGridSpec(
            num_scalar_prefetch=0,
            grid=grid,
            in_specs=[
                pl.BlockSpec((tm, tk), lambda i, j, k: (i, k), **pipe_kwargs),
                pl.BlockSpec((tk, tn), lambda i, j, k: (k, j), **pipe_kwargs),
            ],
            out_specs=pl.BlockSpec((tm, tn), lambda i, j, k: (i, j)),
            scratch_shapes=scratch,
        ),
        compiler_params=pltpu.CompilerParams(
            dimension_semantics=("parallel", "parallel", "arbitrary"),
            vmem_limit_bytes=vmem_limit,
        ),
        cost_estimate=cost,
    )(a, b)

    if (N_p, M_p) != (N, M):
        out = out[:N, :M]
    return out


# ----------------------------------------------------------------------------
# CustomOp wrapper mirroring the PyTorch module's interface
# ----------------------------------------------------------------------------
def generate_antares_expression(ir, feed_dict, extra_outputs):
    """Same bookkeeping as the PyTorch version (string-level only)."""
    input_dict = {
        k: {"dtype": str(v.dtype), "shape": list(v.shape)} for k, v in feed_dict.items()
    }
    ir = ir.replace('"', "`").replace("\n", " ").strip()
    input_dict = json.dumps(input_dict)
    extra_outputs = ", ".join(['"%s"' % x for x in extra_outputs])
    return (
        f'- einstein_v2(input_dict={input_dict}, '
        f'extra_outputs=[{extra_outputs}], exprss="{ir}")'
    )


class CustomOp:
    """JAX/Pallas analogue of the Antares-backed torch CustomOp."""

    _MATMUL_IR = "output0[N, M] +=! input0[N, K] * input1[K, M]"

    def __init__(self, ir, feed_dict, extra_outputs=()):
        ir = ir.replace('"', "`").replace("\n", " ").strip()
        self.ir = ir
        self.expr = generate_antares_expression(ir, feed_dict, list(extra_outputs))
        feed = sorted(feed_dict.items(), key=lambda x: x[0])
        self.values = [v for _, v in feed]
        self.output_names = ["output0"]

    def emit(self):
        # In the torch version this compiles the Antares kernel; here the
        # Pallas kernel is the "compiled" artifact.  The f32-exact path is the
        # default; the bf16 compute path is opt-in only (changes numerics).
        if self.ir != self._MATMUL_IR:
            raise NotImplementedError(
                "Only the matmul einstein_v2 expression is implemented in Pallas."
            )
        self._fn = jax.jit(pallas_matmul)
        return self

    def forward(self):
        return self._fn(*self.values)

    __call__ = forward


# ----------------------------------------------------------------------------
# Main
# ----------------------------------------------------------------------------
if __name__ == "__main__":
    key = jax.random.PRNGKey(0)
    kA, kB, kC, kD = jax.random.split(key, 4)

    N, K, M = 256, 256, 256  # small shapes -> small-problem path, 2-way split
    input0 = jax.random.normal(kA, (N, K), dtype=jnp.float32)
    input1 = jax.random.normal(kB, (K, M), dtype=jnp.float32)
    ref = input0 @ input1

    # 1) f32 path through the CustomOp wrapper.
    op = CustomOp(
        ir="output0[N, M] +=! input0[N, K] * input1[K, M]",
        feed_dict={"input0": input0, "input1": input1},
    ).emit()
    out = jax.block_until_ready(op.forward())
    assert out.shape == (N, M) and out.dtype == jnp.float32
    assert jnp.allclose(out, ref, atol=1e-2, rtol=1e-3), "mismatch vs. jnp reference"

    # 2) Tiled K-loop path (resident f32 output accumulator) via explicit tiles.
    out_tiled = jax.block_until_ready(
        pallas_matmul(input0, input1, tm=128, tn=128, tk=128))
    assert jnp.allclose(out_tiled, ref, atol=1e-2, rtol=1e-3), "tiled path mismatch"

    # 3) Non-tile-divisible shapes: zero-padded operands, sliced output.
    a_odd = jax.random.normal(kC, (200, 264), dtype=jnp.float32)
    b_odd = jax.random.normal(kD, (264, 260), dtype=jnp.float32)
    out_odd = jax.block_until_ready(pallas_matmul(a_odd, b_odd))
    assert out_odd.shape == (200, 260)
    assert jnp.allclose(out_odd, a_odd @ b_odd, atol=1e-2, rtol=1e-3), "padded path mismatch"

    # 4) bf16 compute path (per-tile in-kernel cast, f32 MXU accumulation),
    #    checked against a bf16-input reference.  Fast path on all generations
    #    (v5e included); never silently enabled by the wrapper.
    bf16_mm = jax.jit(functools.partial(
        pallas_matmul, compute_dtype=jnp.bfloat16, out_dtype=jnp.float32))
    out_bf16 = jax.block_until_ready(bf16_mm(input0, input1))
    ref_bf16 = jnp.dot(
        input0.astype(jnp.bfloat16), input1.astype(jnp.bfloat16),
        preferred_element_type=jnp.float32,
    )
    assert out_bf16.shape == (N, M) and out_bf16.dtype == jnp.float32
    assert jnp.allclose(out_bf16, ref_bf16, atol=1e-2, rtol=1e-2), "bf16 path mismatch"

    print("KERNEL_OK")
</pallas_src>

<mosaic_0001>
module attributes {stable_mosaic.version = 11 : i64} {
  func.func @_kernel_direct(%arg0: i32, %arg1: i32, %arg2: i32, %arg3: memref<128x256xf32, #tpu.memory_space<vmem>>, %arg4: memref<256x256xf32, #tpu.memory_space<vmem>>, %arg5: memref<128x256xf32, #tpu.memory_space<vmem>>) attributes {dimension_semantics = [#tpu.dimension_semantics<parallel>, #tpu.dimension_semantics<parallel>, #tpu.dimension_semantics<arbitrary>], iteration_bounds = array<i64: 2, 1, 1>, scalar_prefetch = 0 : i64, scratch_operands = 0 : i64, tpu.core_type = #tpu.core_type<tc>, window_params = [{transform_indices = @transform_0, window_bounds = array<i64: 128, 256>}, {transform_indices = @transform_1, window_bounds = array<i64: 256, 256>}, {transform_indices = @transform_2, window_bounds = array<i64: 128, 256>}]} {
    %c0 = arith.constant 0 : index
    %c0_0 = arith.constant 0 : index
    %0 = vector.load %arg3[%c0, %c0_0] : memref<128x256xf32, #tpu.memory_space<vmem>>, vector<128x256xf32>
    %c0_1 = arith.constant 0 : index
    %c0_2 = arith.constant 0 : index
    %1 = vector.load %arg4[%c0_1, %c0_2] : memref<256x256xf32, #tpu.memory_space<vmem>>, vector<256x256xf32>
    %cst = arith.constant dense<0.000000e+00> : vector<128x256xf32>
    %2 = tpu.matmul %0, %1, %cst {dimension_numbers = #tpu.dot_dimension_numbers<[1], [0], [0], [1], [0, 0, 1, 1], [], []>} : vector<128x256xf32>, vector<256x256xf32>, vector<128x256xf32> -> vector<128x256xf32>
    %c0_3 = arith.constant 0 : index
    %c0_4 = arith.constant 0 : index
    %3 = vector.load %arg5[%c0_3, %c0_4] : memref<128x256xf32, #tpu.memory_space<vmem>>, vector<128x256xf32>
    tpu.vector_store %arg5[%c0_3, %c0_4], %2 {strides = array<i32>} : memref<128x256xf32, #tpu.memory_space<vmem>>, vector<128x256xf32>,
    return
  }
  func.func @transform_0(%arg0: i32, %arg1: i32, %arg2: i32) -> (i32, i32) {
    %c0_i32 = arith.constant 0 : i32
    return %arg0, %arg2 : i32, i32
  }
  func.func @transform_1(%arg0: i32, %arg1: i32, %arg2: i32) -> (i32, i32) {
    %c0_i32 = arith.constant 0 : i32
    return %arg2, %arg1 : i32, i32
  }
  func.func @transform_2(%arg0: i32, %arg1: i32, %arg2: i32) -> (i32, i32) {
    %c0_i32 = arith.constant 0 : i32
    return %arg0, %arg1 : i32, i32
  }
}

</mosaic_0001>

<bundles_post_ra>
// kernel: pallas_matmul.1
= control target key start
LH: loop header
LB: loop body
LE: loop exit
PB: predicated region body
PF: predicated region fallthrough
CT: control target
= control target key end

     0   :  { %7 = vsyncpa [#allocation3], 0  ;;  %s1219_s0 = inlined_call_operand.hbm [shape: f32[256,256], index: 0, kind: input, shape index: {}]   ;;  %s1220_s1 = inlined_call_operand.hbm [shape: f32[256,256], index: 1, kind: input, shape index: {}]   ;;  %s1221_s2 = inlined_call_operand.hbm [shape: f32[256,256], index: 2, kind: output, shape index: {}]  }
   0x1   :  { %9 = vsyncpa [#allocation3 + $0x1], 0 }
   0x2   :  { %10 = vsyncpa [#allocation6], 0 }
   0x3   :  { %11 = vsyncpa [#allocation4], 0 }
   0x4   :  { %13 = vsyncpa [#allocation4 + $0x1], 0  ;;  %s959_s9 = smov 0   ;;  %s961_s10 = smov 0  }
   0x5   :  { %s963_s11 = smov 0   ;;  %s965_s12 = smov 0  }
   0x6   :  { %s967_s13 = smov 0   ;;  %s969_s14 = smov 0  }
   0x7 LB: > { %s633_s15 = sadd.s32 4294967295, %s935_s14   ;;  %s634_s16 = sadd.s32 4294967294, %s935_s14   ;;  %s935_s14 = sphi %s969_s14, %s19_s14   ;;  %s931_s13 = sphi %s967_s13, %s1241_s13   ;;  %s927_s12 = sphi %s965_s12, %s1240_s12   ;;  %s923_s11 = sphi %s963_s11, %s1239_s11   ;;  %s919_s10 = sphi %s961_s10, %s1238_s10   ;;  %s915_s9 = sphi %s959_s9, %s1237_s9  }
   0x8   : > { %p60_p0 = scmp.ne.s32.totalorder %s919_s10, %s915_s9  ;;  %p993_p1 = scmp.eq.s32.totalorder %s633_s15, 0 }
   0x9   : > { %p997_p2 = scmp.eq.s32.totalorder %s633_s15, 1  ;;  %p120_p3 = scmp.eq.s32.totalorder %s634_s16, 1 }
   0xa   : > { %p1003_p4 = por %p993_p1, %p60_p0  ;;  %p635_p5 = scmp.ge.s32.totalorder %s935_s14, 1 }
   0xb   : > { %p1008_p6 = por %p120_p3, %p60_p0  ;;  %p127_p7 = scmp.lt.s32.totalorder %s935_s14, 3 }
   0xc   : > { %s1226_s19 = scalar_select %p1003_p4, 1, 0 }
   0xd   : > { %s1227_s20 = scalar_select %p1008_p6, 1, 0 }
   0xe   : > { %p1013_p8 = pnand %p635_p5, %p127_p7  ;;  %s937_s22 = smov [#allocation5]  }
   0xf   : > { %s145_s23 = sshll.u32 %s937_s22, 4  ;;  %s38_s25 = sadd.s32 1, %s931_s13  ;;  %s146_s23 = int_to_ptr.vmem [resolvable:$true] %s145_s23 }
  0x10   : > { %p728_p9 = pneg %p1013_p8  ;;  %s808_s26 = scalar_lea.vmem %s146_s23, 8192 }
  0x11   : > { %p809_p13 = scmp.ne.s32.totalorder %s146_s23, %s808_s26  ;;  %p816_p5 = scmp.lt.s32.totalorder %s146_s23, %s146_s23 }
  0x12   : > { %p1022_p11 = pnand %p728_p9, %p993_p1  ;;  %p817_p7 = scmp.lt.s32.totalorder %s808_s26, %s808_s26 }
  0x14   : > { %p799_p12 = pneg %p1022_p11  ;;  %p818_p6 = por %p817_p7, %p816_p5 }
  0x16   : > { %p811_p0 = pnand %p809_p13, %p799_p12 }
  0x18   : > { %p812_p3 = pneg %p811_p0 }
  0x1a   : > { %p819_p4 = pnand %p818_p6, %p812_p3 }
  0x1c   : > { %822 = shalt.err (!%p819_p4)
}
  0x1d   : > { %s1223_s27 = smov 256   ;;  %s939_s28 = smov 16  }
  0x1e   : > { %731 = dma.hbm_to_vmem [thread:$0]  (!%p1022_p11), %s1220_s1, 8192, %s146_s23, [#allocation6], %s1223_s27, %s1223_s27, %s939_s28  }
  0x1f   : > { %p40_p4 = scmp.ge.s32.totalorder %s38_s25, 2  ;;  %s47_s3 = sadd.s32 1, %s923_s11 }
  0x20   : > { %p54_p6 = scmp.ne.s32.totalorder %s923_s11, %s919_s10  ;;  %p55_p9 = scmp.eq.s32.totalorder %s935_s14, 0 }
  0x21   : > { %s1243_s25 = smov (%p40_p4, %s38_s25), 0  ;;  %p741_p0 = scmp.lt.s32.totalorder %s935_s14, 2 }
  0x22   : > { %p1043_p12 = por %p55_p9, %p54_p6  ;;  %p1049_p13 = por %p997_p2, %p54_p6 }
  0x23   : > { %s42_s6 = ssub.s32 %s931_s13, %s1243_s25  ;;  %s159_s7 = sand.u32 1, %s923_s11  }
  0x24   : > { %p45_p11 = scmp.eq.s32.totalorder %s42_s6, 0  ;;  %s638_s8 = sshll.u32 %s159_s7, 8 }
  0x25   : > { %s653_s16 = sshll.u32 %s931_s13, 12  ;;  %s163_s26 = scalar_lea.vmem [#allocation2], %s638_s8 }
  0x26   : > { %s1058_s15 = scalar_select %p45_p11, %s923_s11, %s47_s3  }
  0x27   : > { %s172_s24 = scalar_lea.hbm %s1219_s0, %s653_s16  ;;  %s173_s29 = sshll.u32 %s163_s26, 4  ;;  %s174_s29 = int_to_ptr.vmem [resolvable:$true] %s173_s29 }
  0x28   : > { %p1066_p2 = pnand %p741_p0, %p1043_p12  ;;  %s160_s30 = scalar_lea.sflag [#allocation3], %s159_s7 }
  0x29   : > { %s836_s6 = scalar_lea.vmem %s174_s29, 4096  ;;  %s940_s3 = smov [#allocation2]  }
  0x2a   : > { %p825_p3 = pneg %p1066_p2  ;;  %p837_p5 = scmp.ne.s32.totalorder %s174_s29, %s836_s6 }
  0x2b   : > { %s841_s27 = sshll.u32 %s940_s3, 4  ;;  %s842_s27 = int_to_ptr.vmem [resolvable:$false] %s841_s27 }
  0x2c   : > { %p839_p7 = pnand %p837_p5, %p825_p3  ;;  %s843_s16 = scalar_lea.vmem %s842_s27, 8192 }
  0x2d   : > { %p844_p6 = scmp.lt.s32.totalorder %s174_s29, %s842_s27  ;;  %p845_p9 = scmp.lt.s32.totalorder %s843_s16, %s836_s6 }
  0x2e   : > { %p840_p4 = pneg %p839_p7 }
  0x2f   : > { %p846_p11 = por %p845_p9, %p844_p6 }
  0x31   : > { %p847_p10 = pnand %p846_p11, %p840_p4 }
  0x33   : > { %850 = shalt.err (!%p847_p10)
}
  0x34   : > { %s1233_s4 = smov 256   ;;  %185 = sbr.rel (%p1013_p8) target bundleno = 363 (0x16b), region = 28 }
  0x35   : > { %735 = dma.hbm_to_vmem [thread:$0]  (!%p1066_p2), %s172_s24, 4096, %s174_s29, %s160_s30, %s1233_s4, %s1233_s4, %s939_s28  }
  0x36   : > { %s1080_s7 = sand.u32 (!%p1013_p8), 1, %s919_s10   ;;  %p1234_p10 = scmp.ne.s32.totalorder (!%p1013_p8), %s1226_s19, 0 }
  0x37   : > { %s643_s27 = sshll.u32 (!%p1013_p8), %s1080_s7, 8  ;;  %s188_s8 = scalar_lea.sflag (!%p1013_p8), [#allocation3], %s1080_s7 }
  0x38   : > { %s1086_s22 = scalar_lea.vmem (!%p1013_p8), [#allocation2], %s643_s27 }
  0x39   : > { %902 = dma.done.wait (%p1234_p10), %s188_s8, 4096  }
  0x3a   : > { %904 = vsyncadd (%p1234_p10), %s188_s8, 4294963200 }
  0x3b   : > { %906 = dma.done.wait (%p993_p1), [#allocation6], 8192  }
  0x3c   : > { %908 = vsyncadd (%p993_p1), [#allocation6], 4294959104  ;;  %v285_v0 = vld [vmem:[#allocation5 + $0xf8] sm:$0xff]  ;;  %v284_v1 = vld [vmem:[#allocation5 + $0xf0] sm:$0xff]  ;;  %s1130_s17 = scalar_lea.vmem [#allocation7], %s643_s27  ;;  %s655_s19 = sshll.u32 %s927_s12, 12 }
  0x3d   : > { %v283_v2 = vld [vmem:[#allocation5 + $0xe8] sm:$0xff]  ;;  %318 = vmatprep.subr.mxu0 %v285_v0  ;;  %656 = vmatprep.subr.mxu1 %v285_v0  ;;  %v282_v3 = vld [vmem:[#allocation5 + $0xe0] sm:$0xff]  ;;  %v281_v4 = vld [vmem:[#allocation5 + $0xd8] sm:$0xff]  ;;  %s528_s21 = sshll.u32 %s1130_s17, 4  ;;  %s1165_s24 = scalar_lea.hbm %s1221_s2, %s655_s19  ;;  %s1167_s21 = int_to_ptr.vmem [resolvable:$true] %s528_s21 }
  0x3e   : > { %319 = vmatpush1.msra.mxu0 %v284_v1  ;;  %688 = vmatpush1.msra.mxu1 %v284_v1  ;;  %v280_v5 = vld [vmem:[#allocation5 + $0xd0] sm:$0xff]  ;;  %v279_v6 = vld [vmem:[#allocation5 + $0xc8] sm:$0xff]  ;;  %v278_v7 = vld [vmem:[#allocation5 + $0xc0] sm:$0xff]  ;;  %s512_s12 = scalar_lea.sflag [#allocation4], %s1080_s7  ;;  %s851_s26 = scalar_lea.vmem %s1167_s21, 4096 }
  0x3f   : > { %320 = vmatprep.subr.mxu0 %v283_v2  ;;  %657 = vmatprep.subr.mxu1 %v283_v2  ;;  %v277_v8 = vld [vmem:[#allocation5 + $0xb8] sm:$0xff]  ;;  %v276_v9 = vld [vmem:[#allocation5 + $0xb0] sm:$0xff]  ;;  %v275_v10 = vld [vmem:[#allocation5 + $0xa8] sm:$0xff]  ;;  %p852_p1 = scmp.ne.s32.totalorder %s1167_s21, %s851_s26  ;;  %s941_s29 = smov [#allocation7]  }
  0x40   : > { %321 = vmatpush1.msra.mxu0 %v282_v3  ;;  %689 = vmatpush1.msra.mxu1 %v282_v3  ;;  %v274_v11 = vld [vmem:[#allocation5 + $0xa0] sm:$0xff]  ;;  %v273_v12 = vld [vmem:[#allocation5 + $0x98] sm:$0xff]  ;;  %v272_v13 = vld [vmem:[#allocation5 + $0x90] sm:$0xff]  ;;  %s855_s18 = sshll.u32 %s941_s29, 4  ;;  %s856_s18 = int_to_ptr.vmem [resolvable:$false] %s855_s18 }
  0x41   : > { %322 = vmatprep.subr.mxu0 %v281_v4  ;;  %658 = vmatprep.subr.mxu1 %v281_v4  ;;  %v271_v14 = vld [vmem:[#allocation5 + $0x88] sm:$0xff]  ;;  %v270_v15 = vld [vmem:[#allocation5 + $0x80] sm:$0xff]  ;;  %v269_v16 = vld [vmem:[#allocation5 + $0x78] sm:$0xff]  ;;  %p853_p8 = pnand %p852_p1, %p1049_p13  ;;  %s857_s30 = scalar_lea.vmem %s856_s18, 8192 }
  0x42   : > { %323 = vmatpush1.msra.mxu0 %v280_v5  ;;  %690 = vmatpush1.msra.mxu1 %v280_v5  ;;  %v268_v17 = vld [vmem:[#allocation5 + $0x70] sm:$0xff]  ;;  %v267_v18 = vld [vmem:[#allocation5 + $0x68] sm:$0xff]  ;;  %v266_v19 = vld [vmem:[#allocation5 + $0x60] sm:$0xff]  ;;  %p858_p0 = scmp.lt.s32.totalorder %s1167_s21, %s856_s18  ;;  %p859_p2 = scmp.lt.s32.totalorder %s857_s30, %s851_s26 }
  0x43   : > { %324 = vmatprep.subr.mxu0 %v279_v6  ;;  %659 = vmatprep.subr.mxu1 %v279_v6  ;;  %v265_v20 = vld [vmem:[#allocation5 + $0x58] sm:$0xff]  ;;  %v264_v21 = vld [vmem:[#allocation5 + $0x50] sm:$0xff]  ;;  %v263_v22 = vld [vmem:[#allocation5 + $0x48] sm:$0xff]  ;;  %p854_p12 = pneg %p853_p8 }
  0x44   : > { %325 = vmatpush1.msra.mxu0 %v278_v7  ;;  %691 = vmatpush1.msra.mxu1 %v278_v7  ;;  %v262_v23 = vld [vmem:[#allocation5 + $0x40] sm:$0xff]  ;;  %v261_v24 = vld [vmem:[#allocation5 + $0x38] sm:$0xff]  ;;  %v260_v25 = vld [vmem:[#allocation5 + $0x30] sm:$0xff]  ;;  %p860_p3 = por %p859_p2, %p858_p0 }
  0x45   : > { %326 = vmatprep.subr.mxu0 %v277_v8  ;;  %660 = vmatprep.subr.mxu1 %v277_v8  ;;  %v259_v26 = vld [vmem:[#allocation5 + $0x28] sm:$0xff]  ;;  %v258_v27 = vld [vmem:[#allocation5 + $0x20] sm:$0xff]  ;;  %v257_v28 = vld [vmem:[#allocation5 + $0x18] sm:$0xff] }
  0x46   : > { %327 = vmatpush1.msra.mxu0 %v276_v9  ;;  %692 = vmatpush1.msra.mxu1 %v276_v9  ;;  %v256_v29 = vld [vmem:[#allocation5 + $0x10] sm:$0xff]  ;;  %v255_v30 = vld [vmem:[#allocation5 + $0x8] sm:$0xff]  ;;  %v254_v31 = vld [vmem:[#allocation5] sm:$0xff]  ;;  %p861_p5 = pnand %p860_p3, %p854_p12 }
  0x47   : > { %328 = vmatprep.subr.mxu0 %v275_v10  ;;  %661 = vmatprep.subr.mxu1 %v275_v10  ;;  %v317_v32 = vld [vmem:[#allocation5 + $0x1f8] sm:$0xff]  ;;  %v316_v33 = vld [vmem:[#allocation5 + $0x1f0] sm:$0xff]  ;;  %v315_v34 = vld [vmem:[#allocation5 + $0x1e8] sm:$0xff] }
  0x48   : > { %329 = vmatpush1.msra.mxu0 %v274_v11  ;;  %693 = vmatpush1.msra.mxu1 %v274_v11  ;;  %v314_v35 = vld [vmem:[#allocation5 + $0x1e0] sm:$0xff]  ;;  %v313_v36 = vld [vmem:[#allocation5 + $0x1d8] sm:$0xff]  ;;  %v312_v37 = vld [vmem:[#allocation5 + $0x1d0] sm:$0xff] }
  0x49   : > { %330 = vmatprep.subr.mxu0 %v273_v12  ;;  %662 = vmatprep.subr.mxu1 %v273_v12  ;;  %v311_v38 = vld [vmem:[#allocation5 + $0x1c8] sm:$0xff]  ;;  %v310_v39 = vld [vmem:[#allocation5 + $0x1c0] sm:$0xff]  ;;  %v309_v40 = vld [vmem:[#allocation5 + $0x1b8] sm:$0xff] }
  0x4a   : > { %331 = vmatpush1.msra.mxu0 %v272_v13  ;;  %694 = vmatpush1.msra.mxu1 %v272_v13  ;;  %v308_v41 = vld [vmem:[#allocation5 + $0x1b0] sm:$0xff]  ;;  %v307_v42 = vld [vmem:[#allocation5 + $0x1a8] sm:$0xff]  ;;  %v306_v43 = vld [vmem:[#allocation5 + $0x1a0] sm:$0xff] }
  0x4b   : > { %332 = vmatprep.subr.mxu0 %v271_v14  ;;  %663 = vmatprep.subr.mxu1 %v271_v14  ;;  %v305_v44 = vld [vmem:[#allocation5 + $0x198] sm:$0xff]  ;;  %v304_v45 = vld [vmem:[#allocation5 + $0x190] sm:$0xff]  ;;  %v303_v46 = vld [vmem:[#allocation5 + $0x188] sm:$0xff] }
  0x4c   : > { %333 = vmatpush1.msra.mxu0 %v270_v15  ;;  %695 = vmatpush1.msra.mxu1 %v270_v15  ;;  %v302_v47 = vld [vmem:[#allocation5 + $0x180] sm:$0xff]  ;;  %v301_v48 = vld [vmem:[#allocation5 + $0x178] sm:$0xff]  ;;  %v300_v49 = vld [vmem:[#allocation5 + $0x170] sm:$0xff] }
  0x4d   : > { %334 = vmatprep.subr.mxu0 %v269_v16  ;;  %664 = vmatprep.subr.mxu1 %v269_v16  ;;  %v299_v50 = vld [vmem:[#allocation5 + $0x168] sm:$0xff]  ;;  %v298_v51 = vld [vmem:[#allocation5 + $0x160] sm:$0xff]  ;;  %v297_v52 = vld [vmem:[#allocation5 + $0x158] sm:$0xff] }
  0x4e   : > { %335 = vmatpush1.msra.mxu0 %v268_v17  ;;  %696 = vmatpush1.msra.mxu1 %v268_v17  ;;  %v296_v53 = vld [vmem:[#allocation5 + $0x150] sm:$0xff]  ;;  %v295_v54 = vld [vmem:[#allocation5 + $0x148] sm:$0xff]  ;;  %v294_v55 = vld [vmem:[#allocation5 + $0x140] sm:$0xff] }
  0x4f   : > { %336 = vmatprep.subr.mxu0 %v267_v18  ;;  %665 = vmatprep.subr.mxu1 %v267_v18  ;;  %v293_v56 = vld [vmem:[#allocation5 + $0x138] sm:$0xff]  ;;  %v292_v57 = vld [vmem:[#allocation5 + $0x130] sm:$0xff]  ;;  %v291_v58 = vld [vmem:[#allocation5 + $0x128] sm:$0xff] }
  0x50   : > { %337 = vmatpush1.msra.mxu0 %v266_v19  ;;  %697 = vmatpush1.msra.mxu1 %v266_v19  ;;  %v290_v59 = vld [vmem:[#allocation5 + $0x120] sm:$0xff]  ;;  %v289_v60 = vld [vmem:[#allocation5 + $0x118] sm:$0xff]  ;;  %v288_v61 = vld [vmem:[#allocation5 + $0x110] sm:$0xff] }
  0x51   : > { %338 = vmatprep.subr.mxu0 %v265_v20  ;;  %666 = vmatprep.subr.mxu1 %v265_v20  ;;  %v287_v62 = vld [vmem:[#allocation5 + $0x108] sm:$0xff]  ;;  %v286_v63 = vld [vmem:[#allocation5 + $0x100] sm:$0xff]  ;;  %v225_v4 = vld [vmem:[%s1086_s22 + $0x18] sm:$0xff] }
  0x52   : > { %339 = vmatpush1.msra.mxu0 %v264_v21  ;;  %698 = vmatpush1.msra.mxu1 %v264_v21  ;;  %v223_v0 = vld [vmem:[%s1086_s22 + $0x8] sm:$0xff]  ;;  %v222_v2 = vld [vmem:[%s1086_s22] sm:$0xff]  ;;  %v241_v5 = vld [vmem:[%s1086_s22 + $0x98] sm:$0xff] }
  0x53   : > { %340 = vmatprep.subr.mxu0 %v263_v22  ;;  %667 = vmatprep.subr.mxu1 %v263_v22  ;;  %v239_v1 = vld [vmem:[%s1086_s22 + $0x88] sm:$0xff]  ;;  %v238_v3 = vld [vmem:[%s1086_s22 + $0x80] sm:$0xff]  ;;  %v224_v6 = vld [vmem:[%s1086_s22 + $0x10] sm:$0xff] }
  0x54   : > { %341 = vmatpush1.msra.mxu0 %v262_v23  ;;  %699 = vmatpush1.msra.mxu1 %v262_v23  ;;  %v240_v7 = vld [vmem:[%s1086_s22 + $0x90] sm:$0xff]  ;;  %v227_v8 = vld [vmem:[%s1086_s22 + $0x28] sm:$0xff]  ;;  %v226_v10 = vld [vmem:[%s1086_s22 + $0x20] sm:$0xff] }
  0x55   : > { %342 = vmatprep.subr.mxu0 %v261_v24  ;;  %668 = vmatprep.subr.mxu1 %v261_v24  ;;  %v243_v9 = vld [vmem:[%s1086_s22 + $0xa8] sm:$0xff]  ;;  %v242_v11 = vld [vmem:[%s1086_s22 + $0xa0] sm:$0xff]  ;;  %v229_v12 = vld [vmem:[%s1086_s22 + $0x38] sm:$0xff] }
  0x56   : > { %343 = vmatpush1.msra.mxu0 %v260_v25  ;;  %700 = vmatpush1.msra.mxu1 %v260_v25  ;;  %v245_v13 = vld [vmem:[%s1086_s22 + $0xb8] sm:$0xff]  ;;  %v228_v14 = vld [vmem:[%s1086_s22 + $0x30] sm:$0xff]  ;;  %v231_v16 = vld [vmem:[%s1086_s22 + $0x48] sm:$0xff] }
  0x57   : > { %344 = vmatprep.subr.mxu0 %v259_v26  ;;  %669 = vmatprep.subr.mxu1 %v259_v26  ;;  %v244_v15 = vld [vmem:[%s1086_s22 + $0xb0] sm:$0xff]  ;;  %v247_v17 = vld [vmem:[%s1086_s22 + $0xc8] sm:$0xff]  ;;  %v230_v18 = vld [vmem:[%s1086_s22 + $0x40] sm:$0xff] }
  0x58   : > { %345 = vmatpush1.msra.mxu0 %v258_v27  ;;  %701 = vmatpush1.msra.mxu1 %v258_v27  ;;  %v246_v19 = vld [vmem:[%s1086_s22 + $0xc0] sm:$0xff]  ;;  %v233_v20 = vld [vmem:[%s1086_s22 + $0x58] sm:$0xff]  ;;  %v232_v22 = vld [vmem:[%s1086_s22 + $0x50] sm:$0xff] }
  0x59   : > { %346 = vmatprep.subr.mxu0 %v257_v28  ;;  %670 = vmatprep.subr.mxu1 %v257_v28  ;;  %v249_v21 = vld [vmem:[%s1086_s22 + $0xd8] sm:$0xff]  ;;  %v248_v23 = vld [vmem:[%s1086_s22 + $0xd0] sm:$0xff]  ;;  %v235_v24 = vld [vmem:[%s1086_s22 + $0x68] sm:$0xff] }
  0x5a   : > { %347 = vmatpush1.msra.mxu0 %v256_v29  ;;  %702 = vmatpush1.msra.mxu1 %v256_v29  ;;  %v251_v25 = vld [vmem:[%s1086_s22 + $0xe8] sm:$0xff]  ;;  %v234_v26 = vld [vmem:[%s1086_s22 + $0x60] sm:$0xff]  ;;  %v237_v28 = vld [vmem:[%s1086_s22 + $0x78] sm:$0xff] }
  0x5b   : > { %348 = vmatprep.subr.mxu0 %v255_v30  ;;  %671 = vmatprep.subr.mxu1 %v255_v30  ;;  %v250_v27 = vld [vmem:[%s1086_s22 + $0xe0] sm:$0xff]  ;;  %v253_v29 = vld [vmem:[%s1086_s22 + $0xf8] sm:$0xff]  ;;  %v236_v30 = vld [vmem:[%s1086_s22 + $0x70] sm:$0xff] }
  0x5c   : > { %349 = vmatpush1.msra.mxu0 %v254_v31  ;;  %703 = vmatpush1.msra.mxu1 %v254_v31  ;;  %v252_v31 = vld [vmem:[%s1086_s22 + $0xf0] sm:$0xff] }
  0x5d   : > { %350 = vmatprep.subr.mxu0 %v317_v32  ;;  %672 = vmatprep.subr.mxu1 %v317_v32 }
  0x5e   : > { %351 = vmatpush2.msra.mxu0 %v316_v33  ;;  %704 = vmatpush2.msra.mxu1 %v316_v33 }
  0x5f   : > { %352 = vmatprep.subr.mxu0 %v315_v34  ;;  %673 = vmatprep.subr.mxu1 %v315_v34 }
  0x60   : > { %353 = vmatpush2.msra.mxu0 %v314_v35  ;;  %705 = vmatpush2.msra.mxu1 %v314_v35 }
  0x61   : > { %354 = vmatprep.subr.mxu0 %v313_v36  ;;  %674 = vmatprep.subr.mxu1 %v313_v36 }
  0x62   : > { %355 = vmatpush2.msra.mxu0 %v312_v37  ;;  %706 = vmatpush2.msra.mxu1 %v312_v37 }
  0x63   : > { %356 = vmatprep.subr.mxu0 %v311_v38  ;;  %675 = vmatprep.subr.mxu1 %v311_v38 }
  0x64   : > { %357 = vmatpush2.msra.mxu0 %v310_v39  ;;  %707 = vmatpush2.msra.mxu1 %v310_v39 }
  0x65   : > { %358 = vmatprep.subr.mxu0 %v309_v40  ;;  %676 = vmatprep.subr.mxu1 %v309_v40 }
  0x66   : > { %359 = vmatpush2.msra.mxu0 %v308_v41  ;;  %708 = vmatpush2.msra.mxu1 %v308_v41 }
  0x67   : > { %360 = vmatprep.subr.mxu0 %v307_v42  ;;  %677 = vmatprep.subr.mxu1 %v307_v42 }
  0x68   : > { %361 = vmatpush2.msra.mxu0 %v306_v43  ;;  %709 = vmatpush2.msra.mxu1 %v306_v43 }
  0x69   : > { %362 = vmatprep.subr.mxu0 %v305_v44  ;;  %678 = vmatprep.subr.mxu1 %v305_v44 }
  0x6a   : > { %363 = vmatpush2.msra.mxu0 %v304_v45  ;;  %710 = vmatpush2.msra.mxu1 %v304_v45 }
  0x6b   : > { %364 = vmatprep.subr.mxu0 %v303_v46  ;;  %679 = vmatprep.subr.mxu1 %v303_v46 }
  0x6c   : > { %365 = vmatpush2.msra.mxu0 %v302_v47  ;;  %711 = vmatpush2.msra.mxu1 %v302_v47 }
  0x6d   : > { %366 = vmatprep.subr.mxu0 %v301_v48  ;;  %680 = vmatprep.subr.mxu1 %v301_v48 }
  0x6e   : > { %367 = vmatpush2.msra.mxu0 %v300_v49  ;;  %712 = vmatpush2.msra.mxu1 %v300_v49 }
  0x6f   : > { %368 = vmatprep.subr.mxu0 %v299_v50  ;;  %681 = vmatprep.subr.mxu1 %v299_v50 }
  0x70   : > { %369 = vmatpush2.msra.mxu0 %v298_v51  ;;  %713 = vmatpush2.msra.mxu1 %v298_v51 }
  0x71   : > { %370 = vmatprep.subr.mxu0 %v297_v52  ;;  %682 = vmatprep.subr.mxu1 %v297_v52 }
  0x72   : > { %371 = vmatpush2.msra.mxu0 %v296_v53  ;;  %714 = vmatpush2.msra.mxu1 %v296_v53 }
  0x73   : > { %372 = vmatprep.subr.mxu0 %v295_v54  ;;  %683 = vmatprep.subr.mxu1 %v295_v54 }
  0x74   : > { %373 = vmatpush2.msra.mxu0 %v294_v55  ;;  %715 = vmatpush2.msra.mxu1 %v294_v55 }
  0x75   : > { %374 = vmatprep.subr.mxu0 %v293_v56  ;;  %684 = vmatprep.subr.mxu1 %v293_v56 }
  0x76   : > { %375 = vmatpush2.msra.mxu0 %v292_v57  ;;  %716 = vmatpush2.msra.mxu1 %v292_v57 }
  0x77   : > { %376 = vmatprep.subr.mxu0 %v291_v58  ;;  %685 = vmatprep.subr.mxu1 %v291_v58 }
  0x78   : > { %377 = vmatpush2.msra.mxu0 %v290_v59  ;;  %717 = vmatpush2.msra.mxu1 %v290_v59 }
  0x79   : > { %378 = vmatprep.subr.mxu0 %v289_v60  ;;  %686 = vmatprep.subr.mxu1 %v289_v60 }
  0x7a   : > { %379 = vmatpush2.msra.mxu0 %v288_v61  ;;  %718 = vmatpush2.msra.mxu1 %v288_v61 }
  0x7b   : > { %380 = vmatprep.subr.mxu0 %v287_v62  ;;  %687 = vmatprep.subr.mxu1 %v287_v62 }
  0x7c   : > { %381 = vmatpush2.msra.mxu0 %v286_v63  ;;  %719 = vmatpush2.msra.mxu1 %v286_v63 }
  0x7d   : > { %382 = vmatprep.mubr.f32.mxu0 %v223_v0  ;;  %430 = vmatprep.mubr.f32.mxu1 %v239_v1 }
  0x7e   : > { %383 = vmatmul.mubr.f32.vlgmr.msra.gmra.mxu0 %v222_v2  ;;  %431 = vmatmul.mubr.f32.vlgmr.msra.gmra.mxu1 %v238_v3 }
  0x7f   : > { %388 = vmatprep.mubr.f32.mxu0 %v225_v4  ;;  %436 = vmatprep.mubr.f32.mxu1 %v241_v5 }
  0x82   : > { %389 = vmatmul.mubr.f32.gmra.mxu0 %v224_v6  ;;  %437 = vmatmul.mubr.f32.gmra.mxu1 %v240_v7 }
  0x83   : > { %394 = vmatprep.mubr.f32.mxu0 %v227_v8  ;;  %442 = vmatprep.mubr.f32.mxu1 %v243_v9 }
  0x86   : > { %395 = vmatmul.mubr.f32.gmra.mxu0 %v226_v10  ;;  %443 = vmatmul.mubr.f32.gmra.mxu1 %v242_v11 }
  0x87   : > { %400 = vmatprep.mubr.f32.mxu0 %v229_v12  ;;  %448 = vmatprep.mubr.f32.mxu1 %v245_v13 }
  0x8a   : > { %401 = vmatmul.mubr.f32.gmra.mxu0 %v228_v14  ;;  %449 = vmatmul.mubr.f32.gmra.mxu1 %v244_v15 }
  0x8b   : > { %406 = vmatprep.mubr.f32.mxu0 %v231_v16  ;;  %454 = vmatprep.mubr.f32.mxu1 %v247_v17 }
  0x8e   : > { %407 = vmatmul.mubr.f32.gmra.mxu0 %v230_v18  ;;  %455 = vmatmul.mubr.f32.gmra.mxu1 %v246_v19 }
  0x8f   : > { %412 = vmatprep.mubr.f32.mxu0 %v233_v20  ;;  %460 = vmatprep.mubr.f32.mxu1 %v249_v21 }
  0x92   : > { %413 = vmatmul.mubr.f32.gmra.mxu0 %v232_v22  ;;  %461 = vmatmul.mubr.f32.gmra.mxu1 %v248_v23 }
  0x93   : > { %418 = vmatprep.mubr.f32.mxu0 %v235_v24  ;;  %466 = vmatprep.mubr.f32.mxu1 %v251_v25 }
  0x96   : > { %419 = vmatmul.mubr.f32.gmra.mxu0 %v234_v26  ;;  %467 = vmatmul.mubr.f32.gmra.mxu1 %v250_v27 }
  0x97   : > { %424 = vmatprep.mubr.f32.mxu0 %v237_v28  ;;  %472 = vmatprep.mubr.f32.mxu1 %v253_v29 }
  0x9a   : > { %425 = vmatmul.mubr.f32.gmra.mxu0 %v236_v30  ;;  %473 = vmatmul.mubr.f32.gmra.mxu1 %v252_v31 }
 0x13e   : > { %v384_v32 = vpop.f32.mrf.mxu0  ;;  %v432_v33 = vpop.f32.mrf.mxu1 }
 0x13f   : > { %479 = vst [vmem:[%s1130_s17] sm:$0xff] %v384_v32  ;;  %495 = vst [vmem:[%s1130_s17 + $0x80] sm:$0xff] %v432_v33 }
 0x140   : > { %v386_v34 = vpop.f32.mrf.mxu0  ;;  %v434_v35 = vpop.f32.mrf.mxu1 }
 0x141   : > { %480 = vst [vmem:[%s1130_s17 + $0x8] sm:$0xff] %v386_v34  ;;  %496 = vst [vmem:[%s1130_s17 + $0x88] sm:$0xff] %v434_v35 }
 0x142   : > { %v390_v36 = vpop.f32.mrf.mxu0  ;;  %v438_v37 = vpop.f32.mrf.mxu1 }
 0x143   : > { %481 = vst [vmem:[%s1130_s17 + $0x10] sm:$0xff] %v390_v36  ;;  %497 = vst [vmem:[%s1130_s17 + $0x90] sm:$0xff] %v438_v37 }
 0x144   : > { %v392_v38 = vpop.f32.mrf.mxu0  ;;  %v440_v39 = vpop.f32.mrf.mxu1 }
 0x145   : > { %482 = vst [vmem:[%s1130_s17 + $0x18] sm:$0xff] %v392_v38  ;;  %498 = vst [vmem:[%s1130_s17 + $0x98] sm:$0xff] %v440_v39 }
 0x146   : > { %v396_v40 = vpop.f32.mrf.mxu0  ;;  %v444_v41 = vpop.f32.mrf.mxu1 }
 0x147   : > { %483 = vst [vmem:[%s1130_s17 + $0x20] sm:$0xff] %v396_v40  ;;  %499 = vst [vmem:[%s1130_s17 + $0xa0] sm:$0xff] %v444_v41 }
 0x148   : > { %v398_v42 = vpop.f32.mrf.mxu0  ;;  %v446_v43 = vpop.f32.mrf.mxu1 }
 0x149   : > { %484 = vst [vmem:[%s1130_s17 + $0x28] sm:$0xff] %v398_v42  ;;  %500 = vst [vmem:[%s1130_s17 + $0xa8] sm:$0xff] %v446_v43 }
 0x14a   : > { %v402_v44 = vpop.f32.mrf.mxu0  ;;  %v450_v45 = vpop.f32.mrf.mxu1 }
 0x14b   : > { %485 = vst [vmem:[%s1130_s17 + $0x30] sm:$0xff] %v402_v44  ;;  %501 = vst [vmem:[%s1130_s17 + $0xb0] sm:$0xff] %v450_v45 }
 0x14c   : > { %v404_v46 = vpop.f32.mrf.mxu0  ;;  %v452_v47 = vpop.f32.mrf.mxu1 }
 0x14d   : > { %486 = vst [vmem:[%s1130_s17 + $0x38] sm:$0xff] %v404_v46  ;;  %502 = vst [vmem:[%s1130_s17 + $0xb8] sm:$0xff] %v452_v47 }
 0x14e   : > { %v408_v48 = vpop.f32.mrf.mxu0  ;;  %v456_v49 = vpop.f32.mrf.mxu1 }
 0x14f   : > { %487 = vst [vmem:[%s1130_s17 + $0x40] sm:$0xff] %v408_v48  ;;  %503 = vst [vmem:[%s1130_s17 + $0xc0] sm:$0xff] %v456_v49 }
 0x150   : > { %v410_v50 = vpop.f32.mrf.mxu0  ;;  %v458_v51 = vpop.f32.mrf.mxu1 }
 0x151   : > { %488 = vst [vmem:[%s1130_s17 + $0x48] sm:$0xff] %v410_v50  ;;  %504 = vst [vmem:[%s1130_s17 + $0xc8] sm:$0xff] %v458_v51 }
 0x152   : > { %v414_v52 = vpop.f32.mrf.mxu0  ;;  %v462_v53 = vpop.f32.mrf.mxu1 }
 0x153   : > { %489 = vst [vmem:[%s1130_s17 + $0x50] sm:$0xff] %v414_v52  ;;  %505 = vst [vmem:[%s1130_s17 + $0xd0] sm:$0xff] %v462_v53 }
 0x154   : > { %v416_v54 = vpop.f32.mrf.mxu0  ;;  %v464_v55 = vpop.f32.mrf.mxu1 }
 0x155   : > { %490 = vst [vmem:[%s1130_s17 + $0x58] sm:$0xff] %v416_v54  ;;  %506 = vst [vmem:[%s1130_s17 + $0xd8] sm:$0xff] %v464_v55 }
 0x156   : > { %v420_v56 = vpop.f32.mrf.mxu0  ;;  %v468_v57 = vpop.f32.mrf.mxu1 }
 0x157   : > { %491 = vst [vmem:[%s1130_s17 + $0x60] sm:$0xff] %v420_v56  ;;  %507 = vst [vmem:[%s1130_s17 + $0xe0] sm:$0xff] %v468_v57 }
 0x158   : > { %v422_v58 = vpop.f32.mrf.mxu0  ;;  %v470_v59 = vpop.f32.mrf.mxu1 }
 0x159   : > { %492 = vst [vmem:[%s1130_s17 + $0x68] sm:$0xff] %v422_v58  ;;  %508 = vst [vmem:[%s1130_s17 + $0xe8] sm:$0xff] %v470_v59 }
 0x15a   : > { %v426_v60 = vpop.f32.mrf.mxu0  ;;  %v474_v61 = vpop.f32.mrf.mxu1 }
 0x15b   : > { %493 = vst [vmem:[%s1130_s17 + $0x70] sm:$0xff] %v426_v60  ;;  %509 = vst [vmem:[%s1130_s17 + $0xf0] sm:$0xff] %v474_v61 }
 0x15c   : > { %v428_v62 = vpop.f32.mrf.mxu0  ;;  %v476_v63 = vpop.f32.mrf.mxu1 }
 0x15d   : > { %494 = vst [vmem:[%s1130_s17 + $0x78] sm:$0xff] %v428_v62  ;;  %510 = vst [vmem:[%s1130_s17 + $0xf8] sm:$0xff] %v476_v63 }
 0x15e   : > { %864 = shalt.err (!%p861_p5)
}
 0x15f   : > { %s865_s6 = scalar_lea.hbm %s1165_s24, 4096  ;;  %s869_s4 = scalar_lea.hbm %s1221_s2, 8192 }
 0x160   : > { %p866_p7 = scmp.ne.s32.totalorder %s1165_s24, %s865_s6  ;;  %p870_p9 = scmp.lt.s32.totalorder %s1165_s24, %s1221_s2 }
 0x161   : > { %p871_p11 = scmp.lt.s32.totalorder %s869_s4, %s865_s6 }
 0x162   : > { %p867_p4 = pnand %p866_p7, %p1049_p13 }
 0x163   : > { %p872_p10 = por %p871_p11, %p870_p9 }
 0x164   : > { %p868_p6 = pneg %p867_p4 }
 0x166   : > { %p873_p1 = pnand %p872_p10, %p868_p6 }
 0x168   : > { %876 = shalt.err (!%p873_p1)
}
 0x169   : > { %s942_s22 = smov 256   ;;  %s943_s17 = smov 16  }
 0x16a   : > { %726 = dma.vmem_to_hbm [thread:$0]  (%p1049_p13), %s1167_s21, 4096, %s1165_s24, %s512_s12, %s942_s22, %s942_s22, %s943_s17  }
 0x16b PF: > { %s543_s19 = sand.u32 1, %s915_s9   ;;  %p1235_p8 = scmp.ne.s32.totalorder %s1227_s20, 0 }
 0x16c   : > { %p1236_p12 = scmp.ge.s32.totalorder %s935_s14, 2  ;;  %s544_s28 = scalar_lea.sflag [#allocation4], %s543_s19 }
 0x16e   : > { %p737_p0 = pnand %p1236_p12, %p1235_p8 }
 0x170   : > { %p738_p2 = pneg %p737_p0 }
 0x172   : > { %910 = dma.done.wait (%p738_p2), %s544_s28, 4096  }
 0x173   : > { %912 = vsyncadd (%p738_p2), %s544_s28, 4294963200  ;;  %s19_s14 = sadd.s32 1, %s935_s14   ;;  %s1237_s9 = smov %s919_s10 }
 0x174   : > { %p16_p3 = scmp.ge.s32.totalorder %s19_s14, 4   ;;  %s1238_s10 = smov %s923_s11 }
 0x175   : > { %s1239_s11 = smov %s1058_s15  ;;  %s1240_s12 = smov %s931_s13 }
 0x176   : > { %s1241_s13 = smov %s1243_s25  ;;  %18 = sbr.rel (!%p16_p3) target bundleno = 7 (0x7), region = 78 }
 0x17b   :  { %549 = vsyncpa [#allocation3], 1 }
 0x17c   :  { %551 = vsyncpa [#allocation3 + $0x1], 1 }
 0x17d   :  { %552 = vsyncpa [#allocation6], 1 }
 0x17e   :  { %553 = vsyncpa [#allocation4], 1 }
 0x17f   :  { %555 = vsyncpa [#allocation4 + $0x1], 1 }

</bundles_post_ra>
